<compile_context>
chip_gen: v5e
topology: v5e:2x2
jax: 0.10.0
libtpu: 0.0.40
codegen_flags: <defaults>
</compile_context>

<pallas_src>
import functools
import math

import jax
import jax.numpy as jnp
from jax.experimental import pallas as pl
from jax.experimental.pallas import tpu as pltpu

_LANE = 128
_VMEM_LIMIT_CAP = 48 * 2**20          # stay well under v7x's 64 MiB VMEM
_RESIDENT_B_MAX_BYTES = 8 * 2**20     # keep B (W / XW) VMEM-resident below this


def _round_up(x, m):
    return ((x + m - 1) // m) * m


def _pick_tile(d, cap):
    """Largest multiple of 128 that divides d and is <= cap (d % 128 == 0)."""
    best = _LANE
    t = _LANE
    limit = min(d, cap)
    while t <= limit:
        if d % t == 0:
            best = t
        t += _LANE
    return best


# ---------------------------------------------------------------------------
# Resident-B matmul: A streamed in (tm, tk) tiles, B fully resident in VMEM
# (constant-index BlockSpec -> single DMA), output covers the full width N.
# Grid = (M // tm, K // tk).
# ---------------------------------------------------------------------------
def _mm_resident_kernel(a_ref, b_ref, o_ref, acc_ref):
    k = pl.program_id(1)
    tk = a_ref.shape[1]
    start = pl.multiple_of(k * tk, _LANE)
    partial = jnp.dot(a_ref[...], b_ref[pl.ds(start, tk), :],
                      preferred_element_type=jnp.float32)

    @pl.when(k == 0)
    def _first():
        acc_ref[...] = partial            # direct assign: no zero-fill pass

    @pl.when(k != 0)
    def _accum():
        acc_ref[...] += partial

    @pl.when(k == pl.num_programs(1) - 1)
    def _store():
        o_ref[...] = acc_ref[...].astype(o_ref.dtype)


def _mm_resident_bias_kernel(a_ref, b_ref, bias_ref, o_ref, acc_ref):
    k = pl.program_id(1)
    tk = a_ref.shape[1]
    start = pl.multiple_of(k * tk, _LANE)
    partial = jnp.dot(a_ref[...], b_ref[pl.ds(start, tk), :],
                      preferred_element_type=jnp.float32)

    @pl.when(k == 0)
    def _first():
        acc_ref[...] = partial

    @pl.when(k != 0)
    def _accum():
        acc_ref[...] += partial

    @pl.when(k == pl.num_programs(1) - 1)
    def _store():
        # Bias added exactly once, in f32, on the accumulator (finalize only).
        o_ref[...] = (acc_ref[...] + bias_ref[...]).astype(o_ref.dtype)


def _matmul_resident_b(a, b, bias=None, out_dtype=jnp.float32):
    """out = a @ b (+ bias), B kept fully resident in VMEM. Dims % 128 == 0."""
    M, K = a.shape
    K2, N = b.shape
    assert K == K2
    # Keep >= 2 row tiles where possible (megacore sharding of the parallel axis).
    tm_cap = min(512, max(_LANE, M // 2))
    tm = _pick_tile(M, tm_cap)
    tk = _pick_tile(K, 512)
    grid = (M // tm, K // tk)

    in_specs = [
        pl.BlockSpec((tm, tk), lambda i, k: (i, k)),   # A: streamed exactly once
        pl.BlockSpec((K, N), lambda i, k: (0, 0)),     # B: VMEM-resident (1 DMA)
    ]
    args = (a, b)
    kernel = _mm_resident_kernel
    bias_bytes = 0
    if bias is not None:
        in_specs.append(pl.BlockSpec((1, N), lambda i, k: (0, 0)))
        args = (a, b, bias)
        kernel = _mm_resident_bias_kernel
        bias_bytes = bias.size * bias.dtype.itemsize

    out_itemsize = jnp.dtype(out_dtype).itemsize
    need = (2 * tm * tk * a.dtype.itemsize            # double-buffered A tiles
            + 2 * K * N * b.dtype.itemsize            # resident B (conservative x2)
            + 2 * tm * N * out_itemsize               # output tiles
            + (2 * N * 4 if bias is not None else 0)
            + tm * N * 4)                             # f32 accumulator
    vmem_limit = int(min(_VMEM_LIMIT_CAP, max(32 * 2**20, int(1.25 * need))))

    cost = pl.CostEstimate(
        flops=2 * M * K * N,
        transcendentals=0,
        bytes_accessed=(a.size * a.dtype.itemsize + b.size * b.dtype.itemsize
                        + bias_bytes + M * N * out_itemsize),
    )

    return pl.pallas_call(
        kernel,
        out_shape=jax.ShapeDtypeStruct((M, N), out_dtype),
        grid_spec=pltpu.PrefetchScalarGridSpec(
            num_scalar_prefetch=0,
            grid=grid,
            in_specs=in_specs,
            out_specs=pl.BlockSpec((tm, N), lambda i, k: (i, 0)),
            scratch_shapes=[pltpu.VMEM((tm, N), jnp.float32)],
        ),
        compiler_params=pltpu.CompilerParams(
            dimension_semantics=("parallel", "arbitrary"),
            vmem_limit_bytes=vmem_limit,
        ),
        cost_estimate=cost,
    )(*args)


# ---------------------------------------------------------------------------
# Generic 3-D tiled-matmul fallback (for B operands too big to keep resident).
# ---------------------------------------------------------------------------
def _mm_tiled_kernel(a_ref, b_ref, o_ref, acc_ref):
    k = pl.program_id(2)
    partial = jnp.dot(a_ref[...], b_ref[...], preferred_element_type=jnp.float32)

    @pl.when(k == 0)
    def _first():
        acc_ref[...] = partial

    @pl.when(k != 0)
    def _accum():
        acc_ref[...] += partial

    @pl.when(k == pl.num_programs(2) - 1)
    def _store():
        o_ref[...] = acc_ref[...].astype(o_ref.dtype)


def _mm_tiled_bias_kernel(a_ref, b_ref, bias_ref, o_ref, acc_ref):
    k = pl.program_id(2)
    partial = jnp.dot(a_ref[...], b_ref[...], preferred_element_type=jnp.float32)

    @pl.when(k == 0)
    def _first():
        acc_ref[...] = partial

    @pl.when(k != 0)
    def _accum():
        acc_ref[...] += partial

    @pl.when(k == pl.num_programs(2) - 1)
    def _store():
        o_ref[...] = (acc_ref[...] + bias_ref[...]).astype(o_ref.dtype)


def _matmul_tiled(a, b, bias=None, out_dtype=jnp.float32,
                  tm_cap=512, tn_cap=1024, tk_cap=512):
    """out = a @ b (+ bias), classic 3-D grid tiled matmul. Dims % 128 == 0."""
    M, K = a.shape
    K2, N = b.shape
    assert K == K2
    tm = _pick_tile(M, min(tm_cap, max(_LANE, M // 2)))
    tn = _pick_tile(N, tn_cap)   # wide tn -> adj not re-read across j for typical widths
    tk = _pick_tile(K, tk_cap)
    grid = (M // tm, N // tn, K // tk)

    in_specs = [
        pl.BlockSpec((tm, tk), lambda i, j, k: (i, k)),
        pl.BlockSpec((tk, tn), lambda i, j, k: (k, j)),
    ]
    args = (a, b)
    kernel = _mm_tiled_kernel
    bias_bytes = 0
    if bias is not None:
        in_specs.append(pl.BlockSpec((1, tn), lambda i, j, k: (0, j)))
        args = (a, b, bias)
        kernel = _mm_tiled_bias_kernel
        bias_bytes = bias.size * bias.dtype.itemsize

    out_itemsize = jnp.dtype(out_dtype).itemsize
    need = (2 * (tm * tk * a.dtype.itemsize
                 + tk * tn * b.dtype.itemsize
                 + tm * tn * out_itemsize
                 + (tn * 4 if bias is not None else 0))
            + tm * tn * 4)
    vmem_limit = int(min(_VMEM_LIMIT_CAP, max(32 * 2**20, int(1.5 * need))))

    cost = pl.CostEstimate(
        flops=2 * M * K * N,
        transcendentals=0,
        bytes_accessed=(a.size * a.dtype.itemsize + b.size * b.dtype.itemsize
                        + bias_bytes + M * N * out_itemsize),
    )

    return pl.pallas_call(
        kernel,
        out_shape=jax.ShapeDtypeStruct((M, N), out_dtype),
        grid_spec=pltpu.PrefetchScalarGridSpec(
            num_scalar_prefetch=0,
            grid=grid,
            in_specs=in_specs,
            out_specs=pl.BlockSpec((tm, tn), lambda i, j, k: (i, j)),
            scratch_shapes=[pltpu.VMEM((tm, tn), jnp.float32)],
        ),
        compiler_params=pltpu.CompilerParams(
            dimension_semantics=("parallel", "parallel", "arbitrary"),
            vmem_limit_bytes=vmem_limit,
        ),
        cost_estimate=cost,
    )(*args)


def _matmul(a, b, bias=None, out_dtype=jnp.float32):
    """Dispatch: resident-B kernel when B fits the VMEM budget, else tiled."""
    K, N = b.shape
    if K * N * b.dtype.itemsize <= _RESIDENT_B_MAX_BYTES:
        return _matmul_resident_b(a, b, bias=bias, out_dtype=out_dtype)
    # TODO(synk): for huge XW, fusing pass 1 into pass 2 (emit_pipeline) would
    # additionally save the XW HBM round-trip; two-pass tiled fallback for now.
    return _matmul_tiled(a, b, bias=bias, out_dtype=out_dtype)


# ---------------------------------------------------------------------------
# GCN layer wrapper.
# ---------------------------------------------------------------------------
@functools.partial(jax.jit, static_argnames=("compute_dtype",))
def prepare_adj(adj, compute_dtype=jnp.float32):
    """Pad + cast the adjacency once (it is static across layers / steps)."""
    n = adj.shape[0]
    n_p = _round_up(n, _LANE)
    return jnp.pad(adj.astype(jnp.dtype(compute_dtype)),
                   ((0, n_p - n), (0, n_p - n)))


@functools.partial(jax.jit, static_argnames=("compute_dtype",))
def gcn_layer(x, adj, weight, bias=None, compute_dtype=jnp.float32):
    """out = adj @ (x @ weight) [+ bias], via Pallas TPU tiled matmuls.

    `adj` may be the raw (n, n) adjacency or the cached output of
    prepare_adj() (padded to (n_p, n_p), cast to compute_dtype); in the latter
    case the per-call N^2 pad+cast is skipped entirely.
    """
    n, in_feas = x.shape
    out_feas = weight.shape[1]
    out_dtype = x.dtype
    cdt = jnp.dtype(compute_dtype)

    n_p = _round_up(n, _LANE)
    in_p = _round_up(in_feas, _LANE)
    out_p = _round_up(out_feas, _LANE)

    x_p = jnp.pad(x.astype(cdt), ((0, n_p - n), (0, in_p - in_feas)))
    w_p = jnp.pad(weight.astype(cdt),
                  ((0, in_p - in_feas), (0, out_p - out_feas)))

    if adj.shape == (n_p, n_p) and adj.dtype == cdt:
        adj_p = adj                                 # pre-prepared / cached
    else:
        adj_p = jnp.pad(adj.astype(cdt), ((0, n_p - n), (0, n_p - n)))

    # Pass 1: XW = x @ W  (computed once, kept in compute dtype).
    xw = _matmul(x_p, w_p, out_dtype=cdt)

    # Pass 2: out = adj @ XW (+ bias) -- the dominant, HBM-bound matmul.
    if bias is not None:
        b_p = jnp.pad(bias.astype(jnp.float32),
                      (0, out_p - out_feas)).reshape(1, out_p)
        out = _matmul(adj_p, xw, bias=b_p, out_dtype=out_dtype)
    else:
        out = _matmul(adj_p, xw, out_dtype=out_dtype)

    return out[:n, :out_feas]


def init_gcn_params(key, in_feas, out_feas, bias=True):
    """Deterministic re-implementation of GraphConvolutionLayer.reset_parameters."""
    stdv = 1.0 / math.sqrt(out_feas)
    kw, kb = jax.random.split(key)
    weight = jax.random.uniform(kw, (in_feas, out_feas), jnp.float32, -stdv, stdv)
    b = jax.random.uniform(kb, (out_feas,), jnp.float32, -stdv, stdv) if bias else None
    return weight, b


def _make_inputs(key, n, in_feas):
    k_x, k_adj = jax.random.split(key)
    x = jax.random.normal(k_x, (n, in_feas), jnp.float32)
    a = jax.random.uniform(k_adj, (n, n), jnp.float32)
    adj = (a + a.T) * 0.5
    adj = adj / jnp.sum(adj, axis=1, keepdims=True)
    return x, adj


if __name__ == "__main__":
    key = jax.random.PRNGKey(0)
    k1, k2, k3, kp1, kp2, kp3 = jax.random.split(key, 6)

    # Case 1: small GCN-layer shapes (matches the module's intent).
    N, IN_FEAS, OUT_FEAS = 16, 32, 8
    x, adj = _make_inputs(k1, N, IN_FEAS)
    weight, bias = init_gcn_params(kp1, IN_FEAS, OUT_FEAS, bias=True)

    out = jax.block_until_ready(gcn_layer(x, adj, weight, bias))
    ref = adj @ (x @ weight) + bias
    assert out.shape == (N, OUT_FEAS)
    assert jnp.allclose(out, ref, atol=1e-4, rtol=1e-4)

    # Cached padded adjacency + bf16 compute path (f32 accumulation).
    adj_bf16 = prepare_adj(adj, compute_dtype=jnp.bfloat16)
    out_bf16 = jax.block_until_ready(
        gcn_layer(x, adj_bf16, weight, bias, compute_dtype=jnp.bfloat16))
    assert jnp.allclose(out_bf16, ref, atol=1e-1, rtol=1e-1)

    # No-bias path.
    out_nb = jax.block_until_ready(gcn_layer(x, adj, weight, None))
    assert jnp.allclose(out_nb, adj @ (x @ weight), atol=1e-4, rtol=1e-4)

    # Case 2: non-multiple-of-128 feature dims (padding + multi-row-tile grid).
    N2, IN2, OUT2 = 384, 48, 24
    x2, adj2 = _make_inputs(k2, N2, IN2)
    w2, b2 = init_gcn_params(kp2, IN2, OUT2, bias=True)
    out2 = jax.block_until_ready(gcn_layer(x2, adj2, w2, b2))
    ref2 = adj2 @ (x2 @ w2) + b2
    assert out2.shape == (N2, OUT2)
    assert jnp.allclose(out2, ref2, atol=1e-3, rtol=1e-3)

    # Case 3: larger graph exercising the multi-step k reduction of the
    # resident-B kernel (pass 2: K = 640 -> 5 k-steps of 128).
    N3, IN3, OUT3 = 640, 200, 72
    x3, adj3 = _make_inputs(k3, N3, IN3)
    w3, b3 = init_gcn_params(kp3, IN3, OUT3, bias=True)
    out3 = jax.block_until_ready(gcn_layer(x3, adj3, w3, b3))
    ref3 = adj3 @ (x3 @ w3) + b3
    assert out3.shape == (N3, OUT3)
    assert jnp.allclose(out3, ref3, atol=2e-3, rtol=2e-3)

    # Directly exercise the generic 3-D tiled fallback (used when XW exceeds
    # the VMEM residency threshold), forcing a multi-step k reduction.
    xw3 = x3 @ w3
    xw3_p = jnp.pad(xw3, ((0, 0), (0, 128 - OUT3)))
    out_t = jax.block_until_ready(
        _matmul_tiled(adj3, xw3_p, out_dtype=jnp.float32, tk_cap=128))
    assert jnp.allclose(out_t[:N3, :OUT3], adj3 @ xw3, atol=2e-3, rtol=2e-3)

    print("KERNEL_OK")
</pallas_src>

<mosaic_0001>
module attributes {stable_mosaic.version = 11 : i64} {
  func.func @_mm_resident_kernel(%arg0: i32, %arg1: i32, %arg2: memref<128x128xf32, #tpu.memory_space<vmem>>, %arg3: memref<128x128xf32, #tpu.memory_space<vmem>>, %arg4: memref<128x128xf32, #tpu.memory_space<vmem>>, %arg5: memref<128x128xf32, #tpu.memory_space<vmem>>) attributes {dimension_semantics = [#tpu.dimension_semantics<parallel>, #tpu.dimension_semantics<arbitrary>], iteration_bounds = array<i64: 1, 1>, scalar_prefetch = 0 : i64, scratch_operands = 1 : i64, tpu.core_type = #tpu.core_type<tc>, window_params = [{transform_indices = @transform_0, window_bounds = array<i64: 128, 128>}, {pipeline_mode = #tpu.pipeline_mode<synchronous>, transform_indices = @transform_1, window_bounds = array<i64: 128, 128>}, {transform_indices = @transform_2, window_bounds = array<i64: 128, 128>}]} {
    %c128_i32 = arith.constant 128 : i32
    %0 = arith.muli %arg1, %c128_i32 : i32
    %1 = tpu.assume_multiple %0, 128 : i32
    %c0 = arith.constant 0 : index
    %c0_0 = arith.constant 0 : index
    %2 = vector.load %arg2[%c0, %c0_0] : memref<128x128xf32, #tpu.memory_space<vmem>>, vector<128x128xf32>
    %3 = arith.index_cast %1 : i32 to index
    %c0_1 = arith.constant 0 : index
    %4 = vector.load %arg3[%3, %c0_1] : memref<128x128xf32, #tpu.memory_space<vmem>>, vector<128x128xf32>
    %cst = arith.constant dense<0.000000e+00> : vector<128x128xf32>
    %5 = tpu.matmul %2, %4, %cst {dimension_numbers = #tpu.dot_dimension_numbers<[1], [0], [0], [1], [0, 0, 1, 1], [], []>} : vector<128x128xf32>, vector<128x128xf32>, vector<128x128xf32> -> vector<128x128xf32>
    %c0_i32 = arith.constant 0 : i32
    %6 = arith.cmpi eq, %arg1, %c0_i32 : i32
    %7 = arith.extui %6 : i1 to i32
    %c0_i32_2 = arith.constant 0 : i32
    %8 = arith.cmpi ne, %7, %c0_i32_2 : i32
    scf.if %8 {
      %c0_7 = arith.constant 0 : index
      %c0_8 = arith.constant 0 : index
      %15 = vector.load %arg5[%c0_7, %c0_8] : memref<128x128xf32, #tpu.memory_space<vmem>>, vector<128x128xf32>
      tpu.vector_store %arg5[%c0_7, %c0_8], %5 {strides = array<i32>} : memref<128x128xf32, #tpu.memory_space<vmem>>, vector<128x128xf32>,
    } else {
    }
    %c0_i32_3 = arith.constant 0 : i32
    %9 = arith.cmpi ne, %arg1, %c0_i32_3 : i32
    %10 = arith.extui %9 : i1 to i32
    %c0_i32_4 = arith.constant 0 : i32
    %11 = arith.cmpi ne, %10, %c0_i32_4 : i32
    scf.if %11 {
      %c0_7 = arith.constant 0 : index
      %c0_8 = arith.constant 0 : index
      %15 = vector.load %arg5[%c0_7, %c0_8] : memref<128x128xf32, #tpu.memory_space<vmem>>, vector<128x128xf32>
      %16 = arith.addf %15, %5 : vector<128x128xf32>
      %c0_9 = arith.constant 0 : index
      %c0_10 = arith.constant 0 : index
      %17 = vector.load %arg5[%c0_9, %c0_10] : memref<128x128xf32, #tpu.memory_space<vmem>>, vector<128x128xf32>
      tpu.vector_store %arg5[%c0_9, %c0_10], %16 {strides = array<i32>} : memref<128x128xf32, #tpu.memory_space<vmem>>, vector<128x128xf32>,
    } else {
    }
    %c0_i32_5 = arith.constant 0 : i32
    %12 = arith.cmpi eq, %arg1, %c0_i32_5 : i32
    %13 = arith.extui %12 : i1 to i32
    %c0_i32_6 = arith.constant 0 : i32
    %14 = arith.cmpi ne, %13, %c0_i32_6 : i32
    scf.if %14 {
      %c0_7 = arith.constant 0 : index
      %c0_8 = arith.constant 0 : index
      %15 = vector.load %arg5[%c0_7, %c0_8] : memref<128x128xf32, #tpu.memory_space<vmem>>, vector<128x128xf32>
      %c0_9 = arith.constant 0 : index
      %c0_10 = arith.constant 0 : index
      %16 = vector.load %arg4[%c0_9, %c0_10] : memref<128x128xf32, #tpu.memory_space<vmem>>, vector<128x128xf32>
      tpu.vector_store %arg4[%c0_9, %c0_10], %15 {strides = array<i32>} : memref<128x128xf32, #tpu.memory_space<vmem>>, vector<128x128xf32>,
    } else {
    }
    return
  }
  func.func @transform_0(%arg0: i32, %arg1: i32) -> (i32, i32) {
    %c0_i32 = arith.constant 0 : i32
    return %arg0, %arg1 : i32, i32
  }
  func.func @transform_1(%arg0: i32, %arg1: i32) -> (i32, i32) {
    %c0_i32 = arith.constant 0 : i32
    %c0_i32_0 = arith.constant 0 : i32
    %c0_i32_1 = arith.constant 0 : i32
    return %c0_i32, %c0_i32_0 : i32, i32
  }
  func.func @transform_2(%arg0: i32, %arg1: i32) -> (i32, i32) {
    %c0_i32 = arith.constant 0 : i32
    %c0_i32_0 = arith.constant 0 : i32
    return %arg0, %c0_i32 : i32, i32
  }
}

module attributes {stable_mosaic.version = 11 : i64} {
  func.func @_mm_resident_bias_kernel(%arg0: i32, %arg1: i32, %arg2: memref<128x128xf32, #tpu.memory_space<vmem>>, %arg3: memref<128x128xf32, #tpu.memory_space<vmem>>, %arg4: memref<1x128xf32, #tpu.memory_space<vmem>>, %arg5: memref<128x128xf32, #tpu.memory_space<vmem>>, %arg6: memref<128x128xf32, #tpu.memory_space<vmem>>) attributes {dimension_semantics = [#tpu.dimension_semantics<parallel>, #tpu.dimension_semantics<arbitrary>], iteration_bounds = array<i64: 1, 1>, scalar_prefetch = 0 : i64, scratch_operands = 1 : i64, tpu.core_type = #tpu.core_type<tc>, window_params = [{transform_indices = @transform_0, window_bounds = array<i64: 128, 128>}, {pipeline_mode = #tpu.pipeline_mode<synchronous>, transform_indices = @transform_1, window_bounds = array<i64: 128, 128>}, {pipeline_mode = #tpu.pipeline_mode<synchronous>, transform_indices = @transform_2, window_bounds = array<i64: 1, 128>}, {transform_indices = @transform_3, window_bounds = array<i64: 128, 128>}]} {
    %c128_i32 = arith.constant 128 : i32
    %0 = arith.muli %arg1, %c128_i32 : i32
    %1 = tpu.assume_multiple %0, 128 : i32
    %c0 = arith.constant 0 : index
    %c0_0 = arith.constant 0 : index
    %2 = vector.load %arg2[%c0, %c0_0] : memref<128x128xf32, #tpu.memory_space<vmem>>, vector<128x128xf32>
    %3 = arith.index_cast %1 : i32 to index
    %c0_1 = arith.constant 0 : index
    %4 = vector.load %arg3[%3, %c0_1] : memref<128x128xf32, #tpu.memory_space<vmem>>, vector<128x128xf32>
    %cst = arith.constant dense<0.000000e+00> : vector<128x128xf32>
    %5 = tpu.matmul %2, %4, %cst {dimension_numbers = #tpu.dot_dimension_numbers<[1], [0], [0], [1], [0, 0, 1, 1], [], []>} : vector<128x128xf32>, vector<128x128xf32>, vector<128x128xf32> -> vector<128x128xf32>
    %c0_i32 = arith.constant 0 : i32
    %6 = arith.cmpi eq, %arg1, %c0_i32 : i32
    %7 = arith.extui %6 : i1 to i32
    %c0_i32_2 = arith.constant 0 : i32
    %8 = arith.cmpi ne, %7, %c0_i32_2 : i32
    scf.if %8 {
      %c0_7 = arith.constant 0 : index
      %c0_8 = arith.constant 0 : index
      %15 = vector.load %arg6[%c0_7, %c0_8] : memref<128x128xf32, #tpu.memory_space<vmem>>, vector<128x128xf32>
      tpu.vector_store %arg6[%c0_7, %c0_8], %5 {strides = array<i32>} : memref<128x128xf32, #tpu.memory_space<vmem>>, vector<128x128xf32>,
    } else {
    }
    %c0_i32_3 = arith.constant 0 : i32
    %9 = arith.cmpi ne, %arg1, %c0_i32_3 : i32
    %10 = arith.extui %9 : i1 to i32
    %c0_i32_4 = arith.constant 0 : i32
    %11 = arith.cmpi ne, %10, %c0_i32_4 : i32
    scf.if %11 {
      %c0_7 = arith.constant 0 : index
      %c0_8 = arith.constant 0 : index
      %15 = vector.load %arg6[%c0_7, %c0_8] : memref<128x128xf32, #tpu.memory_space<vmem>>, vector<128x128xf32>
      %16 = arith.addf %15, %5 : vector<128x128xf32>
      %c0_9 = arith.constant 0 : index
      %c0_10 = arith.constant 0 : index
      %17 = vector.load %arg6[%c0_9, %c0_10] : memref<128x128xf32, #tpu.memory_space<vmem>>, vector<128x128xf32>
      tpu.vector_store %arg6[%c0_9, %c0_10], %16 {strides = array<i32>} : memref<128x128xf32, #tpu.memory_space<vmem>>, vector<128x128xf32>,
    } else {
    }
    %c0_i32_5 = arith.constant 0 : i32
    %12 = arith.cmpi eq, %arg1, %c0_i32_5 : i32
    %13 = arith.extui %12 : i1 to i32
    %c0_i32_6 = arith.constant 0 : i32
    %14 = arith.cmpi ne, %13, %c0_i32_6 : i32
    scf.if %14 {
      %c0_7 = arith.constant 0 : index
      %c0_8 = arith.constant 0 : index
      %15 = vector.load %arg6[%c0_7, %c0_8] : memref<128x128xf32, #tpu.memory_space<vmem>>, vector<128x128xf32>
      %c0_9 = arith.constant 0 : index
      %c0_10 = arith.constant 0 : index
      %16 = vector.load %arg4[%c0_9, %c0_10] : memref<1x128xf32, #tpu.memory_space<vmem>>, vector<1x128xf32>
      %17 = vector.broadcast %16 : vector<1x128xf32> to vector<128x128xf32>
      %18 = arith.addf %15, %17 : vector<128x128xf32>
      %c0_11 = arith.constant 0 : index
      %c0_12 = arith.constant 0 : index
      %19 = vector.load %arg5[%c0_11, %c0_12] : memref<128x128xf32, #tpu.memory_space<vmem>>, vector<128x128xf32>
      tpu.vector_store %arg5[%c0_11, %c0_12], %18 {strides = array<i32>} : memref<128x128xf32, #tpu.memory_space<vmem>>, vector<128x128xf32>,
    } else {
    }
    return
  }
  func.func @transform_0(%arg0: i32, %arg1: i32) -> (i32, i32) {
    %c0_i32 = arith.constant 0 : i32
    return %arg0, %arg1 : i32, i32
  }
  func.func @transform_1(%arg0: i32, %arg1: i32) -> (i32, i32) {
    %c0_i32 = arith.constant 0 : i32
    %c0_i32_0 = arith.constant 0 : i32
    %c0_i32_1 = arith.constant 0 : i32
    return %c0_i32, %c0_i32_0 : i32, i32
  }
  func.func @transform_2(%arg0: i32, %arg1: i32) -> (i32, i32) {
    %c0_i32 = arith.constant 0 : i32
    %c0_i32_0 = arith.constant 0 : i32
    %c0_i32_1 = arith.constant 0 : i32
    return %c0_i32, %c0_i32_0 : i32, i32
  }
  func.func @transform_3(%arg0: i32, %arg1: i32) -> (i32, i32) {
    %c0_i32 = arith.constant 0 : i32
    %c0_i32_0 = arith.constant 0 : i32
    return %arg0, %c0_i32 : i32, i32
  }
}

</mosaic_0001>

<bundles_post_ra>
// kernel: gcn_layer.2
= control target key start
LH: loop header
LB: loop body
LE: loop exit
PB: predicated region body
PF: predicated region fallthrough
CT: control target
= control target key end

     0   :  { %s428_s1 = inlined_call_operand.vmem [shape: f32[128,128], index: 1, kind: input, shape index: {}]   ;;  %s429_s0 = inlined_call_operand.vmem [shape: f32[128,128], index: 0, kind: input, shape index: {}]   ;;  %s430_s2 = inlined_call_operand.vmem [shape: f32[128,128], index: 2, kind: output, shape index: {}]  }
   0x1   :  { %v44_v0 = vld [vmem:[%s428_s1 + $0x78] sm:$0xff]  ;;  %v43_v1 = vld [vmem:[%s428_s1 + $0x70] sm:$0xff]  ;;  %v42_v2 = vld [vmem:[%s428_s1 + $0x68] sm:$0xff] }
   0x2   :  { %222 = vmatpush.msra.mxu2 %v44_v0  ;;  %223 = vmatpush.msra.mxu3 %v44_v0  ;;  %v41_v3 = vld [vmem:[%s428_s1 + $0x60] sm:$0xff]  ;;  %v40_v4 = vld [vmem:[%s428_s1 + $0x58] sm:$0xff]  ;;  %v39_v5 = vld [vmem:[%s428_s1 + $0x50] sm:$0xff] }
   0x3   :  { %45 = vmatpush.msra.mxu0 %v44_v0  ;;  %221 = vmatpush.msra.mxu1 %v44_v0  ;;  %v38_v6 = vld [vmem:[%s428_s1 + $0x48] sm:$0xff]  ;;  %v37_v7 = vld [vmem:[%s428_s1 + $0x40] sm:$0xff]  ;;  %v36_v8 = vld [vmem:[%s428_s1 + $0x38] sm:$0xff] }
   0x4   :  { %225 = vmatpush.msra.mxu2 %v43_v1  ;;  %226 = vmatpush.msra.mxu3 %v43_v1  ;;  %v35_v9 = vld [vmem:[%s428_s1 + $0x30] sm:$0xff]  ;;  %v34_v10 = vld [vmem:[%s428_s1 + $0x28] sm:$0xff]  ;;  %v33_v11 = vld [vmem:[%s428_s1 + $0x20] sm:$0xff] }
   0x5   :  { %46 = vmatpush.msra.mxu0 %v43_v1  ;;  %224 = vmatpush.msra.mxu1 %v43_v1  ;;  %v32_v12 = vld [vmem:[%s428_s1 + $0x18] sm:$0xff]  ;;  %v31_v13 = vld [vmem:[%s428_s1 + $0x10] sm:$0xff]  ;;  %v30_v14 = vld [vmem:[%s428_s1 + $0x8] sm:$0xff] }
   0x6   :  { %228 = vmatpush.msra.mxu2 %v42_v2  ;;  %229 = vmatpush.msra.mxu3 %v42_v2  ;;  %v29_v15 = vld [vmem:[%s428_s1] sm:$0xff]  ;;  %v21_v20 = vld [vmem:[%s429_s0 + $0x48] sm:$0xff]  ;;  %v22_v24 = vld [vmem:[%s429_s0 + $0x50] sm:$0xff] }
   0x7   :  { %47 = vmatpush.msra.mxu0 %v42_v2  ;;  %227 = vmatpush.msra.mxu1 %v42_v2  ;;  %v20_v16 = vld [vmem:[%s429_s0 + $0x40] sm:$0xff]  ;;  %v25_v21 = vld [vmem:[%s429_s0 + $0x68] sm:$0xff]  ;;  %v26_v25 = vld [vmem:[%s429_s0 + $0x70] sm:$0xff] }
   0x8   :  { %231 = vmatpush.msra.mxu2 %v41_v3  ;;  %232 = vmatpush.msra.mxu3 %v41_v3  ;;  %v24_v17 = vld [vmem:[%s429_s0 + $0x60] sm:$0xff]  ;;  %v13_v22 = vld [vmem:[%s429_s0 + $0x8] sm:$0xff]  ;;  %v14_v26 = vld [vmem:[%s429_s0 + $0x10] sm:$0xff] }
   0x9   :  { %48 = vmatpush.msra.mxu0 %v41_v3  ;;  %230 = vmatpush.msra.mxu1 %v41_v3  ;;  %v12_v18 = vld [vmem:[%s429_s0] sm:$0xff]  ;;  %v17_v23 = vld [vmem:[%s429_s0 + $0x28] sm:$0xff]  ;;  %v18_v27 = vld [vmem:[%s429_s0 + $0x30] sm:$0xff] }
   0xa   :  { %234 = vmatpush.msra.mxu2 %v40_v4  ;;  %235 = vmatpush.msra.mxu3 %v40_v4  ;;  %v16_v19 = vld [vmem:[%s429_s0 + $0x20] sm:$0xff]  ;;  %v23_v28 = vld [vmem:[%s429_s0 + $0x58] sm:$0xff] }
   0xb   :  { %49 = vmatpush.msra.mxu0 %v40_v4  ;;  %233 = vmatpush.msra.mxu1 %v40_v4  ;;  %v27_v29 = vld [vmem:[%s429_s0 + $0x78] sm:$0xff] }
   0xc   :  { %237 = vmatpush.msra.mxu2 %v39_v5  ;;  %238 = vmatpush.msra.mxu3 %v39_v5  ;;  %v15_v30 = vld [vmem:[%s429_s0 + $0x18] sm:$0xff] }
   0xd   :  { %50 = vmatpush.msra.mxu0 %v39_v5  ;;  %236 = vmatpush.msra.mxu1 %v39_v5  ;;  %v19_v31 = vld [vmem:[%s429_s0 + $0x38] sm:$0xff] }
   0xe   :  { %240 = vmatpush.msra.mxu2 %v38_v6  ;;  %241 = vmatpush.msra.mxu3 %v38_v6 }
   0xf   :  { %51 = vmatpush.msra.mxu0 %v38_v6  ;;  %239 = vmatpush.msra.mxu1 %v38_v6 }
  0x10   :  { %243 = vmatpush.msra.mxu2 %v37_v7  ;;  %244 = vmatpush.msra.mxu3 %v37_v7 }
  0x11   :  { %52 = vmatpush.msra.mxu0 %v37_v7  ;;  %242 = vmatpush.msra.mxu1 %v37_v7 }
  0x12   :  { %246 = vmatpush.msra.mxu2 %v36_v8  ;;  %247 = vmatpush.msra.mxu3 %v36_v8 }
  0x13   :  { %53 = vmatpush.msra.mxu0 %v36_v8  ;;  %245 = vmatpush.msra.mxu1 %v36_v8 }
  0x14   :  { %249 = vmatpush.msra.mxu2 %v35_v9  ;;  %250 = vmatpush.msra.mxu3 %v35_v9 }
  0x15   :  { %54 = vmatpush.msra.mxu0 %v35_v9  ;;  %248 = vmatpush.msra.mxu1 %v35_v9 }
  0x16   :  { %252 = vmatpush.msra.mxu2 %v34_v10  ;;  %253 = vmatpush.msra.mxu3 %v34_v10 }
  0x17   :  { %55 = vmatpush.msra.mxu0 %v34_v10  ;;  %251 = vmatpush.msra.mxu1 %v34_v10 }
  0x18   :  { %255 = vmatpush.msra.mxu2 %v33_v11  ;;  %256 = vmatpush.msra.mxu3 %v33_v11 }
  0x19   :  { %56 = vmatpush.msra.mxu0 %v33_v11  ;;  %254 = vmatpush.msra.mxu1 %v33_v11 }
  0x1a   :  { %258 = vmatpush.msra.mxu2 %v32_v12  ;;  %259 = vmatpush.msra.mxu3 %v32_v12 }
  0x1b   :  { %57 = vmatpush.msra.mxu0 %v32_v12  ;;  %257 = vmatpush.msra.mxu1 %v32_v12 }
  0x1c   :  { %261 = vmatpush.msra.mxu2 %v31_v13  ;;  %262 = vmatpush.msra.mxu3 %v31_v13 }
  0x1d   :  { %58 = vmatpush.msra.mxu0 %v31_v13  ;;  %260 = vmatpush.msra.mxu1 %v31_v13 }
  0x1e   :  { %264 = vmatpush.msra.mxu2 %v30_v14  ;;  %265 = vmatpush.msra.mxu3 %v30_v14 }
  0x1f   :  { %59 = vmatpush.msra.mxu0 %v30_v14  ;;  %263 = vmatpush.msra.mxu1 %v30_v14 }
  0x20   :  { %267 = vmatpush.msra.mxu2 %v29_v15  ;;  %268 = vmatpush.msra.mxu3 %v29_v15 }
  0x21   :  { %85 = vmatmul.f32.vlgmr.msra.gmra.mxu2 %v20_v16  ;;  %97 = vmatmul.f32.vlgmr.msra.gmra.mxu3 %v24_v17 }
  0x22   :  { %60 = vmatpush.msra.mxu0 %v29_v15  ;;  %266 = vmatpush.msra.mxu1 %v29_v15 }
  0x23   :  { %61 = vmatmul.f32.vlgmr.msra.gmra.mxu0 %v12_v18  ;;  %73 = vmatmul.f32.vlgmr.msra.gmra.mxu1 %v16_v19 }
  0x29   :  { %88 = vmatmul.f32.gmra.mxu2 %v21_v20  ;;  %100 = vmatmul.f32.gmra.mxu3 %v25_v21 }
  0x2b   :  { %64 = vmatmul.f32.gmra.mxu0 %v13_v22  ;;  %76 = vmatmul.f32.gmra.mxu1 %v17_v23 }
  0x31   :  { %91 = vmatmul.f32.gmra.mxu2 %v22_v24  ;;  %103 = vmatmul.f32.gmra.mxu3 %v26_v25 }
  0x33   :  { %67 = vmatmul.f32.gmra.mxu0 %v14_v26  ;;  %79 = vmatmul.f32.gmra.mxu1 %v18_v27 }
  0x39   :  { %94 = vmatmul.f32.gmra.mxu2 %v23_v28  ;;  %106 = vmatmul.f32.gmra.mxu3 %v27_v29 }
  0x3b   :  { %70 = vmatmul.f32.gmra.mxu0 %v15_v30  ;;  %82 = vmatmul.f32.gmra.mxu1 %v19_v31 }
  0xa0   :  { %v62_v32 = vpop.f32.mrf.mxu0  ;;  %v74_v33 = vpop.f32.mrf.mxu1 }
  0xa1   :  { %201 = vst [vmem:[%s430_s2] sm:$0xff] %v62_v32 }
  0xa2   :  { %205 = vst [vmem:[%s430_s2 + $0x20] sm:$0xff] %v74_v33 }
  0xa4   :  { %v86_v34 = vpop.f32.mrf.mxu2  ;;  %v98_v35 = vpop.f32.mrf.mxu3 }
  0xa5   :  { %209 = vst [vmem:[%s430_s2 + $0x40] sm:$0xff] %v86_v34 }
  0xa6   :  { %213 = vst [vmem:[%s430_s2 + $0x60] sm:$0xff] %v98_v35 }
  0xa8   :  { %v65_v36 = vpop.f32.mrf.mxu0  ;;  %v77_v37 = vpop.f32.mrf.mxu1 }
  0xa9   :  { %202 = vst [vmem:[%s430_s2 + $0x8] sm:$0xff] %v65_v36 }
  0xaa   :  { %206 = vst [vmem:[%s430_s2 + $0x28] sm:$0xff] %v77_v37 }
  0xac   :  { %v89_v38 = vpop.f32.mrf.mxu2  ;;  %v101_v39 = vpop.f32.mrf.mxu3 }
  0xad   :  { %210 = vst [vmem:[%s430_s2 + $0x48] sm:$0xff] %v89_v38 }
  0xae   :  { %214 = vst [vmem:[%s430_s2 + $0x68] sm:$0xff] %v101_v39 }
  0xb0   :  { %v68_v40 = vpop.f32.mrf.mxu0  ;;  %v80_v41 = vpop.f32.mrf.mxu1 }
  0xb1   :  { %203 = vst [vmem:[%s430_s2 + $0x10] sm:$0xff] %v68_v40 }
  0xb2   :  { %207 = vst [vmem:[%s430_s2 + $0x30] sm:$0xff] %v80_v41 }
  0xb4   :  { %v92_v42 = vpop.f32.mrf.mxu2  ;;  %v104_v43 = vpop.f32.mrf.mxu3 }
  0xb5   :  { %211 = vst [vmem:[%s430_s2 + $0x50] sm:$0xff] %v92_v42 }
  0xb6   :  { %215 = vst [vmem:[%s430_s2 + $0x70] sm:$0xff] %v104_v43 }
  0xb8   :  { %v71_v44 = vpop.f32.mrf.mxu0  ;;  %v83_v45 = vpop.f32.mrf.mxu1 }
  0xb9   :  { %204 = vst [vmem:[%s430_s2 + $0x18] sm:$0xff] %v71_v44 }
  0xba   :  { %208 = vst [vmem:[%s430_s2 + $0x38] sm:$0xff] %v83_v45 }
  0xbc   :  { %v95_v46 = vpop.f32.mrf.mxu2  ;;  %v107_v47 = vpop.f32.mrf.mxu3 }
  0xbd   :  { %212 = vst [vmem:[%s430_s2 + $0x58] sm:$0xff] %v95_v46 }
  0xbe   :  { %216 = vst [vmem:[%s430_s2 + $0x78] sm:$0xff] %v107_v47 }

// kernel: gcn_layer.3
= control target key start
LH: loop header
LB: loop body
LE: loop exit
PB: predicated region body
PF: predicated region fallthrough
CT: control target
= control target key end

     0   :  { %s460_s1 = inlined_call_operand.vmem [shape: f32[128,128], index: 1, kind: input, shape index: {}]   ;;  %s461_s2 = inlined_call_operand.vmem [shape: f32[1,128], index: 2, kind: input, shape index: {}]   ;;  %s462_s0 = inlined_call_operand.vmem [shape: f32[128,128], index: 0, kind: input, shape index: {}]   ;;  %s463_s3 = inlined_call_operand.vmem [shape: f32[128,128], index: 3, kind: output, shape index: {}]  }
   0x1   :  { %v47_v0 = vld [vmem:[%s460_s1 + $0x78] sm:$0xff]  ;;  %v46_v1 = vld [vmem:[%s460_s1 + $0x70] sm:$0xff]  ;;  %v45_v2 = vld [vmem:[%s460_s1 + $0x68] sm:$0xff] }
   0x2   :  { %245 = vmatpush.msra.mxu2 %v47_v0  ;;  %246 = vmatpush.msra.mxu3 %v47_v0  ;;  %v44_v3 = vld [vmem:[%s460_s1 + $0x60] sm:$0xff]  ;;  %v43_v4 = vld [vmem:[%s460_s1 + $0x58] sm:$0xff]  ;;  %v42_v5 = vld [vmem:[%s460_s1 + $0x50] sm:$0xff] }
   0x3   :  { %48 = vmatpush.msra.mxu0 %v47_v0  ;;  %244 = vmatpush.msra.mxu1 %v47_v0  ;;  %v41_v6 = vld [vmem:[%s460_s1 + $0x48] sm:$0xff]  ;;  %v40_v7 = vld [vmem:[%s460_s1 + $0x40] sm:$0xff]  ;;  %v39_v8 = vld [vmem:[%s460_s1 + $0x38] sm:$0xff] }
   0x4   :  { %248 = vmatpush.msra.mxu2 %v46_v1  ;;  %249 = vmatpush.msra.mxu3 %v46_v1  ;;  %v38_v9 = vld [vmem:[%s460_s1 + $0x30] sm:$0xff]  ;;  %v37_v10 = vld [vmem:[%s460_s1 + $0x28] sm:$0xff]  ;;  %v36_v11 = vld [vmem:[%s460_s1 + $0x20] sm:$0xff] }
   0x5   :  { %49 = vmatpush.msra.mxu0 %v46_v1  ;;  %247 = vmatpush.msra.mxu1 %v46_v1  ;;  %v35_v12 = vld [vmem:[%s460_s1 + $0x18] sm:$0xff]  ;;  %v34_v13 = vld [vmem:[%s460_s1 + $0x10] sm:$0xff]  ;;  %v33_v14 = vld [vmem:[%s460_s1 + $0x8] sm:$0xff] }
   0x6   :  { %251 = vmatpush.msra.mxu2 %v45_v2  ;;  %252 = vmatpush.msra.mxu3 %v45_v2  ;;  %v32_v15 = vld [vmem:[%s460_s1] sm:$0xff]  ;;  %v24_v20 = vld [vmem:[%s462_s0 + $0x48] sm:$0xff]  ;;  %v25_v24 = vld [vmem:[%s462_s0 + $0x50] sm:$0xff] }
   0x7   :  { %50 = vmatpush.msra.mxu0 %v45_v2  ;;  %250 = vmatpush.msra.mxu1 %v45_v2  ;;  %v23_v16 = vld [vmem:[%s462_s0 + $0x40] sm:$0xff]  ;;  %v28_v21 = vld [vmem:[%s462_s0 + $0x68] sm:$0xff]  ;;  %v29_v25 = vld [vmem:[%s462_s0 + $0x70] sm:$0xff] }
   0x8   :  { %254 = vmatpush.msra.mxu2 %v44_v3  ;;  %255 = vmatpush.msra.mxu3 %v44_v3  ;;  %v27_v17 = vld [vmem:[%s462_s0 + $0x60] sm:$0xff]  ;;  %v16_v22 = vld [vmem:[%s462_s0 + $0x8] sm:$0xff]  ;;  %v17_v26 = vld [vmem:[%s462_s0 + $0x10] sm:$0xff] }
   0x9   :  { %51 = vmatpush.msra.mxu0 %v44_v3  ;;  %253 = vmatpush.msra.mxu1 %v44_v3  ;;  %v15_v18 = vld [vmem:[%s462_s0] sm:$0xff]  ;;  %v20_v23 = vld [vmem:[%s462_s0 + $0x28] sm:$0xff]  ;;  %v21_v27 = vld [vmem:[%s462_s0 + $0x30] sm:$0xff] }
   0xa   :  { %257 = vmatpush.msra.mxu2 %v43_v4  ;;  %258 = vmatpush.msra.mxu3 %v43_v4  ;;  %v19_v19 = vld [vmem:[%s462_s0 + $0x20] sm:$0xff]  ;;  %v26_v28 = vld [vmem:[%s462_s0 + $0x58] sm:$0xff] }
   0xb   :  { %52 = vmatpush.msra.mxu0 %v43_v4  ;;  %256 = vmatpush.msra.mxu1 %v43_v4  ;;  %v30_v29 = vld [vmem:[%s462_s0 + $0x78] sm:$0xff]  ;;  %v292_v32 = vld [vmem:[%s461_s2] ss:$0 sm:$0xff] }
   0xc   :  { %260 = vmatpush.msra.mxu2 %v42_v5  ;;  %261 = vmatpush.msra.mxu3 %v42_v5  ;;  %v18_v30 = vld [vmem:[%s462_s0 + $0x18] sm:$0xff] }
   0xd   :  { %53 = vmatpush.msra.mxu0 %v42_v5  ;;  %259 = vmatpush.msra.mxu1 %v42_v5  ;;  %v22_v31 = vld [vmem:[%s462_s0 + $0x38] sm:$0xff] }
   0xe   :  { %263 = vmatpush.msra.mxu2 %v41_v6  ;;  %264 = vmatpush.msra.mxu3 %v41_v6 }
   0xf   :  { %54 = vmatpush.msra.mxu0 %v41_v6  ;;  %262 = vmatpush.msra.mxu1 %v41_v6 }
  0x10   :  { %266 = vmatpush.msra.mxu2 %v40_v7  ;;  %267 = vmatpush.msra.mxu3 %v40_v7 }
  0x11   :  { %55 = vmatpush.msra.mxu0 %v40_v7  ;;  %265 = vmatpush.msra.mxu1 %v40_v7 }
  0x12   :  { %269 = vmatpush.msra.mxu2 %v39_v8  ;;  %270 = vmatpush.msra.mxu3 %v39_v8 }
  0x13   :  { %56 = vmatpush.msra.mxu0 %v39_v8  ;;  %268 = vmatpush.msra.mxu1 %v39_v8 }
  0x14   :  { %272 = vmatpush.msra.mxu2 %v38_v9  ;;  %273 = vmatpush.msra.mxu3 %v38_v9 }
  0x15   :  { %57 = vmatpush.msra.mxu0 %v38_v9  ;;  %271 = vmatpush.msra.mxu1 %v38_v9 }
  0x16   :  { %275 = vmatpush.msra.mxu2 %v37_v10  ;;  %276 = vmatpush.msra.mxu3 %v37_v10 }
  0x17   :  { %58 = vmatpush.msra.mxu0 %v37_v10  ;;  %274 = vmatpush.msra.mxu1 %v37_v10 }
  0x18   :  { %278 = vmatpush.msra.mxu2 %v36_v11  ;;  %279 = vmatpush.msra.mxu3 %v36_v11 }
  0x19   :  { %59 = vmatpush.msra.mxu0 %v36_v11  ;;  %277 = vmatpush.msra.mxu1 %v36_v11 }
  0x1a   :  { %281 = vmatpush.msra.mxu2 %v35_v12  ;;  %282 = vmatpush.msra.mxu3 %v35_v12 }
  0x1b   :  { %60 = vmatpush.msra.mxu0 %v35_v12  ;;  %280 = vmatpush.msra.mxu1 %v35_v12 }
  0x1c   :  { %284 = vmatpush.msra.mxu2 %v34_v13  ;;  %285 = vmatpush.msra.mxu3 %v34_v13 }
  0x1d   :  { %61 = vmatpush.msra.mxu0 %v34_v13  ;;  %283 = vmatpush.msra.mxu1 %v34_v13 }
  0x1e   :  { %287 = vmatpush.msra.mxu2 %v33_v14  ;;  %288 = vmatpush.msra.mxu3 %v33_v14 }
  0x1f   :  { %62 = vmatpush.msra.mxu0 %v33_v14  ;;  %286 = vmatpush.msra.mxu1 %v33_v14 }
  0x20   :  { %290 = vmatpush.msra.mxu2 %v32_v15  ;;  %291 = vmatpush.msra.mxu3 %v32_v15 }
  0x21   :  { %88 = vmatmul.f32.vlgmr.msra.gmra.mxu2 %v23_v16  ;;  %100 = vmatmul.f32.vlgmr.msra.gmra.mxu3 %v27_v17 }
  0x22   :  { %63 = vmatpush.msra.mxu0 %v32_v15  ;;  %289 = vmatpush.msra.mxu1 %v32_v15 }
  0x23   :  { %64 = vmatmul.f32.vlgmr.msra.gmra.mxu0 %v15_v18  ;;  %76 = vmatmul.f32.vlgmr.msra.gmra.mxu1 %v19_v19 }
  0x29   :  { %91 = vmatmul.f32.gmra.mxu2 %v24_v20  ;;  %103 = vmatmul.f32.gmra.mxu3 %v28_v21 }
  0x2b   :  { %67 = vmatmul.f32.gmra.mxu0 %v16_v22  ;;  %79 = vmatmul.f32.gmra.mxu1 %v20_v23 }
  0x31   :  { %94 = vmatmul.f32.gmra.mxu2 %v25_v24  ;;  %106 = vmatmul.f32.gmra.mxu3 %v29_v25 }
  0x33   :  { %70 = vmatmul.f32.gmra.mxu0 %v17_v26  ;;  %82 = vmatmul.f32.gmra.mxu1 %v21_v27 }
  0x39   :  { %97 = vmatmul.f32.gmra.mxu2 %v26_v28  ;;  %109 = vmatmul.f32.gmra.mxu3 %v30_v29 }
  0x3b   :  { %73 = vmatmul.f32.gmra.mxu0 %v18_v30  ;;  %85 = vmatmul.f32.gmra.mxu1 %v22_v31 }
  0xa0   :  { %v65_v33 = vpop.f32.mrf.mxu0  ;;  %v77_v34 = vpop.f32.mrf.mxu1 }
  0xa1   :  { %v208_v35 = vadd.f32 %v292_v32, %v65_v33  ;;  %v212_v36 = vadd.f32 %v292_v32, %v77_v34 }
  0xa3   :  { %224 = vst [vmem:[%s463_s3] sm:$0xff] %v208_v35 }
  0xa4   :  { %228 = vst [vmem:[%s463_s3 + $0x20] sm:$0xff] %v212_v36  ;;  %v89_v37 = vpop.f32.mrf.mxu2  ;;  %v101_v38 = vpop.f32.mrf.mxu3 }
  0xa5   :  { %v216_v39 = vadd.f32 %v292_v32, %v89_v37  ;;  %v220_v40 = vadd.f32 %v292_v32, %v101_v38 }
  0xa7   :  { %232 = vst [vmem:[%s463_s3 + $0x40] sm:$0xff] %v216_v39 }
  0xa8   :  { %236 = vst [vmem:[%s463_s3 + $0x60] sm:$0xff] %v220_v40  ;;  %v68_v41 = vpop.f32.mrf.mxu0  ;;  %v80_v42 = vpop.f32.mrf.mxu1 }
  0xa9   :  { %v209_v43 = vadd.f32 %v292_v32, %v68_v41  ;;  %v213_v44 = vadd.f32 %v292_v32, %v80_v42 }
  0xab   :  { %225 = vst [vmem:[%s463_s3 + $0x8] sm:$0xff] %v209_v43 }
  0xac   :  { %229 = vst [vmem:[%s463_s3 + $0x28] sm:$0xff] %v213_v44  ;;  %v92_v45 = vpop.f32.mrf.mxu2  ;;  %v104_v46 = vpop.f32.mrf.mxu3 }
  0xad   :  { %v217_v47 = vadd.f32 %v292_v32, %v92_v45  ;;  %v221_v48 = vadd.f32 %v292_v32, %v104_v46 }
  0xaf   :  { %233 = vst [vmem:[%s463_s3 + $0x48] sm:$0xff] %v217_v47 }
  0xb0   :  { %237 = vst [vmem:[%s463_s3 + $0x68] sm:$0xff] %v221_v48  ;;  %v71_v49 = vpop.f32.mrf.mxu0  ;;  %v83_v50 = vpop.f32.mrf.mxu1 }
  0xb1   :  { %v210_v51 = vadd.f32 %v292_v32, %v71_v49  ;;  %v214_v52 = vadd.f32 %v292_v32, %v83_v50 }
  0xb3   :  { %226 = vst [vmem:[%s463_s3 + $0x10] sm:$0xff] %v210_v51 }
  0xb4   :  { %230 = vst [vmem:[%s463_s3 + $0x30] sm:$0xff] %v214_v52  ;;  %v95_v53 = vpop.f32.mrf.mxu2  ;;  %v107_v54 = vpop.f32.mrf.mxu3 }
  0xb5   :  { %v218_v55 = vadd.f32 %v292_v32, %v95_v53  ;;  %v222_v56 = vadd.f32 %v292_v32, %v107_v54 }
  0xb7   :  { %234 = vst [vmem:[%s463_s3 + $0x50] sm:$0xff] %v218_v55 }
  0xb8   :  { %238 = vst [vmem:[%s463_s3 + $0x70] sm:$0xff] %v222_v56  ;;  %v74_v57 = vpop.f32.mrf.mxu0  ;;  %v86_v58 = vpop.f32.mrf.mxu1 }
  0xb9   :  { %v211_v59 = vadd.f32 %v292_v32, %v74_v57  ;;  %v215_v60 = vadd.f32 %v292_v32, %v86_v58 }
  0xbb   :  { %227 = vst [vmem:[%s463_s3 + $0x18] sm:$0xff] %v211_v59 }
  0xbc   :  { %231 = vst [vmem:[%s463_s3 + $0x38] sm:$0xff] %v215_v60  ;;  %v98_v61 = vpop.f32.mrf.mxu2  ;;  %v110_v62 = vpop.f32.mrf.mxu3 }
  0xbd   :  { %v219_v63 = vadd.f32 %v292_v32, %v98_v61  ;;  %v223_v0 = vadd.f32 %v292_v32, %v110_v62 }
  0xbf   :  { %235 = vst [vmem:[%s463_s3 + $0x58] sm:$0xff] %v219_v63 }
  0xc0   :  { %239 = vst [vmem:[%s463_s3 + $0x78] sm:$0xff] %v223_v0 }

</bundles_post_ra>
